<compile_context>
chip_gen: v5e
topology: v5e:2x2
jax: 0.10.0
libtpu: 0.0.40
codegen_flags: <defaults>
</compile_context>

<pallas_src>
import math

import jax
import jax.numpy as jnp
from jax.experimental import pallas as pl
from jax.experimental.pallas import tpu as pltpu


def _make_encoding(frams: int, dmodel: int) -> jnp.ndarray:
    """Deterministic sinusoidal positional-encoding table, shape (frams, dmodel)."""
    pos = jnp.arange(frams, dtype=jnp.float32)[:, None]                      # (frams, 1)
    div = jnp.exp(jnp.arange(0, dmodel, 2, dtype=jnp.float32)
                  * (-math.log(10000.0) / dmodel))                           # (dmodel//2,)
    ang = pos * div                                                          # (frams, dmodel//2)
    enc = jnp.zeros((frams, dmodel), dtype=jnp.float32)
    enc = enc.at[:, 0::2].set(jnp.sin(ang))
    enc = enc.at[:, 1::2].set(jnp.cos(ang))
    return enc


def _pe_add_kernel(x_ref, pe_ref, o_ref):
    # All refs are matching 2-D (rows, 128) tiles; plain add, explicit astype
    # keeps bf16 outputs bf16.
    o_ref[...] = (x_ref[...] + pe_ref[...]).astype(o_ref.dtype)


def _sublane_multiple(dtype) -> int:
    """Dtype-native packed-sublane granularity: 8 (f32), 16 (bf16), 32 (int8/fp8)."""
    return max(8, 32 // jnp.dtype(dtype).itemsize)


def _pick_row_tile(n_rows: int, row_bytes: int, target_bytes: int, sub: int) -> int:
    """Largest row tile <= target_bytes, multiple of `sub`, preferring divisors of n_rows."""
    if n_rows <= sub or n_rows * row_bytes <= target_bytes:
        return n_rows
    rows = min(n_rows, max(1, target_bytes // max(1, row_bytes)))
    rows = max(sub, (rows // sub) * sub)
    # Prefer a tile that divides n_rows evenly (no masked trailing block), but
    # never shrink below ~half the byte budget (keep DMAs big).
    for cand in range(rows, max(sub, rows // 2) - 1, -sub):
        if n_rows % cand == 0:
            return cand
    return rows


def positional_encoding_forward(x: jnp.ndarray,
                                encode: jnp.ndarray,
                                *,
                                target_block_bytes: int = 4 << 20,
                                vmem_limit_bytes: int = 48 << 20,
                                donate_x: bool = False) -> jnp.ndarray:
    """out = x + encode[:x.shape[2], :]  (broadcast over batch), like the torch forward."""
    B, S, D = x.shape
    if encode.ndim == 3:            # tolerate the torch module's (1, frams, dmodel) buffer
        encode = encode[0]
    # The torch forward slices the frame axis by x.size(2) (== D); the broadcast
    # is only valid when seq == dmodel, which we enforce (same quirk as PyTorch).
    pe = encode[:D, :]
    assert pe.shape == (S, D), "PyTorch forward requires seq == x.size(2) (== dmodel)"
    # NOTE: intentional dtype match vs torch (bf16 x -> bf16 PE/out); halves PE traffic.
    pe = pe.astype(x.dtype)

    itemsize = jnp.dtype(x.dtype).itemsize
    sub = _sublane_multiple(x.dtype)

    # Lane-dense view: flatten each (S, D) plane; pad to a multiple of 128 lanes
    # so every store is an unmasked full-width vst.  The pad/slice only
    # materialize extra copies when S*D % 128 != 0 (rare shapes).
    flat = S * D
    P = ((flat + 127) // 128) * 128
    xf = x.reshape(B, flat)
    pef = pe.reshape(flat)
    if P != flat:
        xf = jnp.pad(xf, ((0, 0), (0, P - flat)))
        pef = jnp.pad(pef, (0, P - flat))
    R, C = P // 128, 128
    plane_bytes = R * C * itemsize

    cost = pl.CostEstimate(flops=B * P, transcendentals=0,
                           bytes_accessed=(2 * B * P + P) * itemsize)
    aliases = {0: 0} if donate_x else {}
    cparams = dict(vmem_limit_bytes=vmem_limit_bytes)

    # ---- Path A: fold several batch planes into one row tile (small planes). ----
    use_fold, k = False, 0
    if B > 1 and 2 * plane_bytes <= target_block_bytes:
        if B * plane_bytes <= target_block_bytes:
            k, use_fold = B, True                     # whole tensor in one tile
        else:
            k0 = sub // math.gcd(sub, R)              # smallest k with (k*R) % sub == 0
            k_cap = target_block_bytes // plane_bytes
            if k0 <= k_cap:
                k, use_fold = (k_cap // k0) * k0, True  # k < B here, sublane-aligned

    if use_fold:
        tR = k * R                                    # rows per tile == k full planes
        x2 = xf.reshape(B * R, C)
        pe_tiled = jnp.tile(pef.reshape(R, C), (k, 1))  # one tile worth of PE (VMEM-resident)
        out = pl.pallas_call(
            _pe_add_kernel,
            out_shape=jax.ShapeDtypeStruct((B * R, C), x.dtype),
            grid_spec=pltpu.PrefetchScalarGridSpec(
                num_scalar_prefetch=0,
                grid=(pl.cdiv(B * R, tR),),
                in_specs=[
                    pl.BlockSpec((tR, C), lambda g: (g, 0)),   # x row tile
                    pl.BlockSpec((tR, C), lambda g: (0, 0)),   # constant-index PE (no re-DMA)
                ],
                out_specs=pl.BlockSpec((tR, C), lambda g: (g, 0)),
            ),
            compiler_params=pltpu.CompilerParams(
                dimension_semantics=("parallel",), **cparams),
            cost_estimate=cost,
            input_output_aliases=aliases,
        )(x2, pe_tiled)
        out = out.reshape(B, P)
    else:
        # ---- Path B: large per-batch planes; tile rows, reuse PE across batch. ----
        x2 = xf.reshape(B, R, C)
        pe2 = pef.reshape(R, C)
        tR = _pick_row_tile(R, C * itemsize, target_block_bytes, sub)
        n_r = pl.cdiv(R, tR)
        # Megacore (v7x): shard on the balanced row axis; only let batch shard
        # when it splits evenly across two cores.
        dims = (("parallel", "parallel") if (B > 1 and B % 2 == 0)
                else ("parallel", "arbitrary"))
        out = pl.pallas_call(
            _pe_add_kernel,
            out_shape=jax.ShapeDtypeStruct((B, R, C), x.dtype),
            grid_spec=pltpu.PrefetchScalarGridSpec(
                num_scalar_prefetch=0,
                # Row-tile axis outermost, batch innermost: PE block index only
                # depends on r, so consecutive steps reuse the resident PE tile.
                grid=(n_r, B),
                in_specs=[
                    pl.BlockSpec((None, tR, C), lambda r, b: (b, r, 0)),  # x tile (batch squeezed)
                    pl.BlockSpec((tR, C), lambda r, b: (r, 0)),           # shared PE tile
                ],
                out_specs=pl.BlockSpec((None, tR, C), lambda r, b: (b, r, 0)),
            ),
            compiler_params=pltpu.CompilerParams(
                dimension_semantics=dims, **cparams),
            cost_estimate=cost,
            input_output_aliases=aliases,
        )(x2, pe2)
        out = out.reshape(B, P)

    if P != flat:
        out = out[:, :flat]
    return out.reshape(B, S, D)


if __name__ == "__main__":
    key = jax.random.PRNGKey(0)

    def check(frams, dmodel, batch, dtype=jnp.float32,
              target_block_bytes=4 << 20, atol=1e-6):
        seq = dmodel  # torch forward requires seq == x.size(2) == dmodel
        enc = _make_encoding(frams, dmodel)                     # (frams, dmodel)
        k = jax.random.fold_in(key, frams * 1000 + dmodel + 7 * batch)
        x = jax.random.normal(k, (batch, seq, dmodel), dtype=jnp.float32).astype(dtype)

        out = positional_encoding_forward(x, enc, target_block_bytes=target_block_bytes)
        out = jax.block_until_ready(out)

        ref = x.astype(jnp.float32) + enc[None, :seq, :]        # pure-JAX reference
        assert out.shape == x.shape and out.dtype == x.dtype
        assert jnp.allclose(out.astype(jnp.float32), ref, atol=atol), (
            f"mismatch at frams={frams} dmodel={dmodel} batch={batch} dtype={dtype}")

    # Whole-tensor fold path (k == B, single grid step), lane-dense.
    check(frams=32, dmodel=16, batch=2)
    # Fold path with k < B and a partial trailing block (tiny tile budget forces it).
    check(frams=64, dmodel=32, batch=5, target_block_bytes=12 * 1024)
    # Per-batch path, odd batch -> ("parallel", "arbitrary"), multi-tile rows, PE reuse.
    check(frams=256, dmodel=128, batch=3, target_block_bytes=32 * 1024)
    # Per-batch path, even batch -> both axes "parallel".
    check(frams=256, dmodel=128, batch=2, target_block_bytes=32 * 1024)
    # Padding path: S*D not a multiple of 128 -> flattened plane padded to 128 lanes.
    check(frams=24, dmodel=12, batch=2)
    # bf16 activations: PE cast in wrapper, sublane multiple = 16, explicit astype on store.
    check(frams=64, dmodel=64, batch=2, dtype=jnp.bfloat16, atol=5e-2)

    print("KERNEL_OK")
</pallas_src>

<mosaic_0001>
module attributes {stable_mosaic.version = 11 : i64} {
  func.func @_pe_add_kernel(%arg0: i32, %arg1: memref<4x128xf32, #tpu.memory_space<vmem>>, %arg2: memref<4x128xf32, #tpu.memory_space<vmem>>, %arg3: memref<4x128xf32, #tpu.memory_space<vmem>>) attributes {dimension_semantics = [#tpu.dimension_semantics<parallel>], iteration_bounds = array<i64: 1>, scalar_prefetch = 0 : i64, scratch_operands = 0 : i64, tpu.core_type = #tpu.core_type<tc>, window_params = [{transform_indices = @transform_0, window_bounds = array<i64: 4, 128>}, {pipeline_mode = #tpu.pipeline_mode<synchronous>, transform_indices = @transform_1, window_bounds = array<i64: 4, 128>}, {transform_indices = @transform_2, window_bounds = array<i64: 4, 128>}]} {
    %c0 = arith.constant 0 : index
    %c0_0 = arith.constant 0 : index
    %0 = vector.load %arg1[%c0, %c0_0] : memref<4x128xf32, #tpu.memory_space<vmem>>, vector<4x128xf32>
    %c0_1 = arith.constant 0 : index
    %c0_2 = arith.constant 0 : index
    %1 = vector.load %arg2[%c0_1, %c0_2] : memref<4x128xf32, #tpu.memory_space<vmem>>, vector<4x128xf32>
    %2 = arith.addf %0, %1 : vector<4x128xf32>
    %c0_3 = arith.constant 0 : index
    %c0_4 = arith.constant 0 : index
    %3 = vector.load %arg3[%c0_3, %c0_4] : memref<4x128xf32, #tpu.memory_space<vmem>>, vector<4x128xf32>
    tpu.vector_store %arg3[%c0_3, %c0_4], %2 {strides = array<i32>} : memref<4x128xf32, #tpu.memory_space<vmem>>, vector<4x128xf32>,
    return
  }
  func.func @transform_0(%arg0: i32) -> (i32, i32) {
    %c0_i32 = arith.constant 0 : i32
    %c0_i32_0 = arith.constant 0 : i32
    return %arg0, %c0_i32 : i32, i32
  }
  func.func @transform_1(%arg0: i32) -> (i32, i32) {
    %c0_i32 = arith.constant 0 : i32
    %c0_i32_0 = arith.constant 0 : i32
    %c0_i32_1 = arith.constant 0 : i32
    return %c0_i32, %c0_i32_0 : i32, i32
  }
  func.func @transform_2(%arg0: i32) -> (i32, i32) {
    %c0_i32 = arith.constant 0 : i32
    %c0_i32_0 = arith.constant 0 : i32
    return %arg0, %c0_i32 : i32, i32
  }
}

</mosaic_0001>

<bundles_post_ra>
// kernel: tpu_custom_call.1
= control target key start
LH: loop header
LB: loop body
LE: loop exit
PB: predicated region body
PF: predicated region fallthrough
CT: control target
= control target key end

     0   :  { %7 = vsyncpa [#allocation3], 0  ;;  %s170_s0 = inlined_call_operand.hbm [shape: f32[4,128], index: 0, kind: input, shape index: {}]   ;;  %s171_s1 = inlined_call_operand.hbm [shape: f32[4,128], index: 1, kind: input, shape index: {}]   ;;  %s172_s2 = inlined_call_operand.hbm [shape: f32[4,128], index: 2, kind: output, shape index: {}]  }
   0x1   :  { %8 = vsyncpa [#allocation6], 0 }
   0x2   :  { %9 = vsyncpa [#allocation4], 0  ;;  %s15_s11 = sshll.u32 %s170_s0, 4  ;;  %s143_s12 = smov [#allocation2]   ;;  %s16_s11 = int_to_ptr.hbm [resolvable:$true] %s15_s11 }
   0x3   :  { %s17_s13 = sshll.u32 %s143_s12, 4  ;;  %s26_s16 = sshll.u32 %s171_s1, 4  ;;  %s18_s13 = int_to_ptr.vmem [resolvable:$true] %s17_s13  ;;  %s27_s16 = int_to_ptr.hbm [resolvable:$true] %s26_s16 }
   0x4   :  { %20 = dma.hbm_to_vmem [thread:$0]  %s16_s11, 64, %s18_s13, [#allocation3]  }
   0x5   :  { %s144_s17 = smov [#allocation5]  }
   0x6   :  { %s28_s18 = sshll.u32 %s144_s17, 4  ;;  %s29_s18 = int_to_ptr.vmem [resolvable:$true] %s28_s18 }
   0x7   :  { %31 = dma.hbm_to_vmem [thread:$0]  %s27_s16, 64, %s29_s18, [#allocation6]  }
   0x8   :  { %137 = dma.done.wait [#allocation3], 64  }
   0x9   :  { %138 = vsyncadd [#allocation3], 4294967232 }
   0xa   :  { %139 = dma.done.wait [#allocation6], 64  }
   0xb   :  { %140 = vsyncadd [#allocation6], 4294967232  ;;  %s145_s19 = smov [#allocation7]   ;;  %s51_s22 = sshll.u32 %s172_s2, 4  ;;  %v40_v0 = vld [vmem:[#allocation2] sm:$0xf]  ;;  %s52_s22 = int_to_ptr.hbm [resolvable:$true] %s51_s22 }
   0xc   :  { %s49_s0 = sshll.u32 %s145_s19, 4  ;;  %v41_v1 = vld [vmem:[#allocation5] sm:$0xf]  ;;  %s50_s0 = int_to_ptr.vmem [resolvable:$true] %s49_s0 }
   0xd   :  { %v42_v2 = vadd.f32 %v41_v1, %v40_v0 }
   0xf   :  { %43 = vst [vmem:[#allocation7] sm:$0xf] %v42_v2 }
  0x10   :  { %54 = dma.vmem_to_hbm [thread:$0]  %s50_s0, 64, %s52_s22, [#allocation4]  }
  0x11   :  { %141 = dma.done.wait [#allocation4], 64  }
  0x12   :  { %142 = vsyncadd [#allocation4], 4294967232 }
  0x13   :  { %59 = vsyncpa [#allocation3], 1 }
  0x14   :  { %60 = vsyncpa [#allocation6], 1 }
  0x15   :  { %61 = vsyncpa [#allocation4], 1 }

</bundles_post_ra>
